<compile_context>
chip_gen: v5e
topology: v5e:2x2
jax: 0.10.0
libtpu: 0.0.40
codegen_flags: <defaults>
</compile_context>

<pallas_src>
import functools
import math

import jax
import jax.numpy as jnp
from jax import lax
from jax.experimental import pallas as pl
from jax.experimental.pallas import tpu as pltpu


# ----------------------------------------------------------------------------
# helpers: tile sizing over the flattened (N*A) axis
# ----------------------------------------------------------------------------
def _pick_tile_cols(total_cols, na, target):
    """Tile width = A * 2^m, a multiple of 128, ~min(target, total)."""
    t = max(1, na)
    while t % 128 != 0 or (t < total_cols and t < target):
        t *= 2
    return t


def _fold_width(tile_cols, na):
    """Width the in-kernel max fold stops at (keeps lane slices vreg-aligned)."""
    w = tile_cols
    while w > na and (w // 2) % na == 0 and (w // 2) % 128 == 0:
        w //= 2
    return w


def _pick_group_batch(b, c_in, tile_cols, bb=None):
    if bb is not None:
        bb = int(bb)
        return bb if (1 <= bb <= b and b % bb == 0) else 1
    # amortize per-grid-step overhead: aim for ~1 MiB of feats per step, but
    # keep >= 2 groups on the parallel grid axis so both v7x TCs get work.
    budget = max(1, (1 << 20) // max(1, c_in * tile_cols * 4))
    best = 1
    for d in range(1, b + 1):
        if b % d == 0 and d <= budget and b // d >= 2:
            best = d
    return best


# ----------------------------------------------------------------------------
# Kernel 1: embed (feats + per-anchor rotated xyz + bias) and max over points
#   feats : (B, C_in, NA_pad)   native layout, anchor-minor columns (free view)
#   xyz   : (B, 8,    NA_pad)   [R_a*xyz, 1, 0,0,0,0] per column (bias channel)
#   w_f   : (C_out, C_in)       w_x : (C_out, 8)
#   out   : (B, C_out, fold_w)  partially folded per-anchor max (lane-dense)
# ----------------------------------------------------------------------------
def _embed_max_kernel(feats_ref, xyz_ref, wf_ref, wx_ref, out_ref, acc_ref,
                      *, bb, tile_cols, fold_w, total_cols, need_mask):
    k = pl.program_id(1)
    last = pl.num_programs(1) - 1

    @pl.when(k == 0)
    def _():
        acc_ref[...] = jnp.full(acc_ref.shape, -jnp.inf, jnp.float32)

    def accumulate(mask_cols):
        for i in range(bb):                                    # static unroll
            y = jnp.dot(wf_ref[...], feats_ref[i],
                        preferred_element_type=jnp.float32)
            y = y + jnp.dot(wx_ref[...], xyz_ref[i],
                            preferred_element_type=jnp.float32)
            if mask_cols:                                      # last tile only
                col = (lax.broadcasted_iota(jnp.int32, (1, tile_cols), 1)
                       + k * tile_cols)
                y = jnp.where(col < total_cols, y, -jnp.inf)
            acc_ref[i] = jnp.maximum(acc_ref[i], y)

    if need_mask:
        @pl.when(k == last)
        def _():
            accumulate(True)

        @pl.when(k != last)
        def _():
            accumulate(False)
    else:
        accumulate(False)

    @pl.when(k == last)
    def _():
        for i in range(bb):
            v = acc_ref[i]                                     # (C_out, tile)
            w = tile_cols
            while w > fold_w:            # only 128-aligned lane halvings here
                h = w // 2
                v = jnp.maximum(v[:, :h], v[:, h:w])
                w = h
            out_ref[i] = v


def pointnet_embed_max(feats_flat, xyz_flat, w_feat, w_xyz, *,
                       total_cols, bb, tile_cols, fold_w):
    b, c_in, na_pad = feats_flat.shape
    c_out = w_feat.shape[0]
    n_k = na_pad // tile_cols
    need_mask = (total_cols != na_pad)

    kernel = functools.partial(
        _embed_max_kernel, bb=bb, tile_cols=tile_cols, fold_w=fold_w,
        total_cols=total_cols, need_mask=need_mask)

    return pl.pallas_call(
        kernel,
        out_shape=jax.ShapeDtypeStruct((b, c_out, fold_w), jnp.float32),
        grid_spec=pltpu.PrefetchScalarGridSpec(
            num_scalar_prefetch=0,
            grid=(b // bb, n_k),
            in_specs=[
                pl.BlockSpec((bb, c_in, tile_cols), lambda g, k: (g, 0, k)),
                pl.BlockSpec((bb, 8, tile_cols), lambda g, k: (g, 0, k)),
                pl.BlockSpec((c_out, c_in), lambda g, k: (0, 0)),
                pl.BlockSpec((c_out, 8), lambda g, k: (0, 0)),
            ],
            out_specs=pl.BlockSpec((bb, c_out, fold_w), lambda g, k: (g, 0, 0)),
            scratch_shapes=[pltpu.VMEM((bb, c_out, tile_cols), jnp.float32)],
        ),
        compiler_params=pltpu.CompilerParams(
            dimension_semantics=("parallel", "arbitrary")),
    )(feats_flat, xyz_flat, w_feat, w_xyz)


# ----------------------------------------------------------------------------
# Kernel 2: per-anchor L2 normalize + anchor pooling + L2 normalize
#   p (B, C_out, A) -> x_norm (B, C_out), feat_norm (B, C_out, A)
# ----------------------------------------------------------------------------
def _pool_norm_kernel(p_ref, wa_ref, ba_ref, x_ref, f_ref,
                      *, pooling, temperature):
    p = p_ref[...]                                             # (B, C, A)

    sq = jnp.sum(p * p, axis=1, keepdims=True)
    f_ref[...] = p * lax.rsqrt(jnp.maximum(sq, 1e-24))

    if pooling == "attention":
        s = jnp.sum(p * wa_ref[...][None], axis=1, keepdims=True) + ba_ref[...]
        s = s * temperature
        s = s - jnp.max(s, axis=2, keepdims=True)
        e = jnp.exp(s)
        conf = e / jnp.sum(e, axis=2, keepdims=True)           # exact divide
        x = jnp.sum(p * conf, axis=2)                          # (B, C)
    elif pooling == "max":
        x = jnp.max(p, axis=2)
    else:  # mean
        x = jnp.mean(p, axis=2)

    sqx = jnp.sum(x * x, axis=1, keepdims=True)
    x_ref[...] = x * lax.rsqrt(jnp.maximum(sqx, 1e-24))


def pool_and_normalize(p, w_att, b_att, *, pooling, temperature):
    b, c, a = p.shape
    return pl.pallas_call(
        functools.partial(_pool_norm_kernel, pooling=pooling,
                          temperature=float(temperature)),
        out_shape=(jax.ShapeDtypeStruct((b, c), jnp.float32),
                   jax.ShapeDtypeStruct((b, c, a), jnp.float32)),
        grid_spec=pltpu.PrefetchScalarGridSpec(
            num_scalar_prefetch=0,
            grid=(1,),
            in_specs=[
                pl.BlockSpec((b, c, a), lambda i: (0, 0, 0)),
                pl.BlockSpec((c, 1), lambda i: (0, 0)),
                pl.BlockSpec((1, 1), lambda i: (0, 0)),
            ],
            out_specs=[
                pl.BlockSpec((b, c), lambda i: (0, 0)),
                pl.BlockSpec((b, c, a), lambda i: (0, 0, 0)),
            ],
        ),
        compiler_params=pltpu.CompilerParams(
            dimension_semantics=("arbitrary",)),
    )(p, w_att, b_att)


# ----------------------------------------------------------------------------
# Module wrapper
# ----------------------------------------------------------------------------
class InvOutBlockPointnetPallas:
    """Pallas port of EPN's InvOutBlockPointnet (PointnetSO3Conv + pooling)."""

    def __init__(self, params, weights, anchors, *, tile_cols=2048, bb=None):
        self.c_in = int(params["dim_in"])
        self.c_out = int(params["mlp"][-1])
        self.na = int(params["kanchor"])
        self.pooling = params.get("pooling", "max")
        self.temperature = float(params.get("temperature", 1.0))
        self.anchors = jnp.asarray(anchors, jnp.float32)        # (A, 3, 3)
        self.tile_target = int(tile_cols)
        self.bb = bb

        w = jnp.asarray(weights["w_embed"], jnp.float32)        # (C_out, 3+C_in)
        b = jnp.asarray(weights["b_embed"], jnp.float32)        # (C_out,)
        assert w.shape == (self.c_out, self.c_in + 3)
        self.w_feat = w[:, 3:]                                  # (C_out, C_in)
        # xyz weight over 8 homogeneous channels: [W_xyz(3) | bias | 0-pad(4)];
        # the constant channel applies the bias inside the same MXU op.
        wx = jnp.zeros((self.c_out, 8), jnp.float32)
        self.w_xyz = wx.at[:, :3].set(w[:, :3]).at[:, 3].set(b)

        self.w_att = jnp.asarray(
            weights.get("w_att", jnp.zeros((1, self.c_out), jnp.float32)),
            jnp.float32).reshape(self.c_out, 1)
        self.b_att = jnp.asarray(
            weights.get("b_att", jnp.zeros((1, 1), jnp.float32)),
            jnp.float32).reshape(1, 1)

        # per-anchor rotation folded into an 8x8 homogeneous matrix (built once)
        rot = jnp.eye(3, dtype=jnp.float32)[None] if self.na == 1 else self.anchors
        aug = jnp.zeros((self.na, 8, 8), jnp.float32)
        self.rot_aug = aug.at[:, :3, :3].set(rot).at[:, 3, 3].set(1.0)

    def __call__(self, xyz, feats):
        # xyz: (B, N, 3) ; feats: (B, C_in, N, A)   (PyTorch layout)
        b, c_in, n, a = feats.shape
        assert a == self.na and c_in == self.c_in
        na_cols = n * a

        tile_cols = _pick_tile_cols(na_cols, a, self.tile_target)
        fold_w = _fold_width(tile_cols, a)
        na_pad = ((na_cols + tile_cols - 1) // tile_cols) * tile_cols
        n_pad = na_pad // a

        # kanchor == 1 uses the raw xyz (vgtk behaviour); otherwise center it.
        xyz_c = xyz if a == 1 else xyz - jnp.mean(xyz, axis=1, keepdims=True)
        # homogeneous xyz [x,y,z,1,0,0,0,0]; padded points keep all-zero rows
        xyz_h = jnp.concatenate(
            [xyz_c, jnp.ones((b, n, 1), jnp.float32),
             jnp.zeros((b, n, 4), jnp.float32)], axis=-1)        # (B, N, 8)
        if n_pad != n:
            xyz_h = jnp.pad(xyz_h, ((0, 0), (0, n_pad - n), (0, 0)))
        # rotate into every anchor frame directly in the anchor-minor column
        # layout the kernel consumes; only 8 channels => ~8/C_in of feats bytes
        xyz_flat = jnp.einsum("aji,bni->bjna", self.rot_aug,
                              xyz_h).reshape(b, 8, n_pad * a)

        # feats consumed in native layout via a FREE reshape (no HBM transpose)
        feats_flat = feats.reshape(b, c_in, na_cols).astype(jnp.float32)
        if na_pad != na_cols:
            # TODO(synk): this pad is a full HBM copy of feats; producers should
            # supply N such that N*A is a multiple of the tile width.
            feats_flat = jnp.pad(feats_flat,
                                 ((0, 0), (0, 0), (0, na_pad - na_cols)))

        bb = _pick_group_batch(b, c_in, tile_cols, self.bb)

        part = pointnet_embed_max(
            feats_flat, xyz_flat, self.w_feat, self.w_xyz,
            total_cols=na_cols, bb=bb, tile_cols=tile_cols, fold_w=fold_w)

        # residual anchor-interleaved fold (B, C_out, fold_w) -> (B, C_out, A):
        # O(B*C_out*fold_w), negligible; kept outside the kernel so all
        # in-kernel lane slices stay vreg-aligned.
        if fold_w == a:
            p = part
        else:
            p = jnp.max(part.reshape(b, self.c_out, fold_w // a, a), axis=2)

        x_norm, f_norm = pool_and_normalize(
            p, self.w_att, self.b_att,
            pooling=self.pooling, temperature=self.temperature)
        # already in the PyTorch layout: (B, C_out), (B, C_out, A)
        return x_norm, f_norm


# ----------------------------------------------------------------------------
# deterministic parameters / anchors and a plain-JAX reference
# ----------------------------------------------------------------------------
def init_weights(key, c_in, c_out):
    k1, k2, k3, k4 = jax.random.split(key, 4)
    fan = c_in + 3
    lim = 1.0 / math.sqrt(fan)
    lim2 = 1.0 / math.sqrt(c_out)
    return {
        "w_embed": jax.random.uniform(k1, (c_out, fan), jnp.float32, -lim, lim),
        "b_embed": jax.random.uniform(k2, (c_out,), jnp.float32, -lim, lim),
        "w_att": jax.random.uniform(k3, (1, c_out), jnp.float32, -lim2, lim2),
        "b_att": jax.random.uniform(k4, (1, 1), jnp.float32, -lim2, lim2),
    }


def make_anchors(na):
    # TODO(synk): vgtk loads a fixed icosahedral rotation table (get_anchors);
    # we use deterministic evenly-spaced z-axis rotations as the anchor set —
    # the kernels themselves are agnostic to the anchor values.
    ang = jnp.arange(na, dtype=jnp.float32) * (2.0 * math.pi / max(na, 1))
    c, s = jnp.cos(ang), jnp.sin(ang)
    z, o = jnp.zeros_like(ang), jnp.ones_like(ang)
    return jnp.stack([jnp.stack([c, -s, z], -1),
                      jnp.stack([s, c, z], -1),
                      jnp.stack([z, z, o], -1)], axis=1)         # (A, 3, 3)


def reference_forward(xyz, feats, weights, anchors, pooling, temperature):
    b, c_in, n, a = feats.shape
    if a == 1:
        xyz_cat = jnp.transpose(xyz, (0, 2, 1))[..., None]
    else:
        xyz_c = xyz - jnp.mean(xyz, axis=1, keepdims=True)
        xyzr = jnp.einsum("aji,bni->bnaj", anchors, xyz_c)
        xyz_cat = jnp.transpose(xyzr, (0, 3, 1, 2))              # (B,3,N,A)
    g = jnp.concatenate([xyz_cat, feats], axis=1)                # (B,3+C_in,N,A)
    y = jnp.einsum("oc,bcna->bona", weights["w_embed"], g)
    y = y + weights["b_embed"][None, :, None, None]
    p = jnp.max(y, axis=2)                                       # (B,C_out,A)
    out_feat = p
    if pooling == "attention":
        attw = jnp.einsum("oc,bca->boa", weights["w_att"], p) + weights["b_att"][0, 0]
        conf = jax.nn.softmax(attw * temperature, axis=2)
        x = jnp.sum(p * conf, axis=-1)
    elif pooling == "max":
        x = jnp.max(p, axis=2)
    else:
        x = jnp.mean(p, axis=2)

    def l2n(v, axis):
        nrm = jnp.sqrt(jnp.sum(v * v, axis=axis, keepdims=True))
        return v / jnp.maximum(nrm, 1e-12)

    return l2n(x, 1), l2n(out_feat, 1)


if __name__ == "__main__":
    B, N, A = 2, 64, 4          # batch, points, anchors (kanchor)
    C_IN, C_OUT = 32, 64        # dim_in, mlp[-1]

    key = jax.random.PRNGKey(0)
    kx, kf, kw = jax.random.split(key, 3)
    xyz = jax.random.normal(kx, (B, N, 3), jnp.float32)
    feats = jax.random.normal(kf, (B, C_IN, N, A), jnp.float32)
    weights = init_weights(kw, C_IN, C_OUT)
    anchors = make_anchors(A)

    # attention pooling
    params_att = {"dim_in": C_IN, "mlp": [C_OUT], "kanchor": A,
                  "pooling": "attention", "temperature": 3.0}
    model_att = InvOutBlockPointnetPallas(params_att, weights, anchors)
    x_out, out_feat = model_att(xyz, feats)
    jax.block_until_ready((x_out, out_feat))
    assert x_out.shape == (B, C_OUT) and out_feat.shape == (B, C_OUT, A)
    x_ref, f_ref = reference_forward(xyz, feats, weights, anchors, "attention", 3.0)
    assert bool(jnp.allclose(x_out, x_ref, atol=2e-4, rtol=2e-4))
    assert bool(jnp.allclose(out_feat, f_ref, atol=2e-4, rtol=2e-4))

    # default 'max' pooling + explicit group batching to exercise the bb>1 path
    params_max = {"dim_in": C_IN, "mlp": [C_OUT], "kanchor": A}
    model_max = InvOutBlockPointnetPallas(params_max, weights, anchors, bb=2)
    xm, fm = model_max(xyz, feats)
    jax.block_until_ready((xm, fm))
    xm_ref, fm_ref = reference_forward(xyz, feats, weights, anchors, "max", 1.0)
    assert bool(jnp.allclose(xm, xm_ref, atol=2e-4, rtol=2e-4))
    assert bool(jnp.allclose(fm, fm_ref, atol=2e-4, rtol=2e-4))

    print("KERNEL_OK")
</pallas_src>

<mosaic_0001>
module attributes {stable_mosaic.version = 11 : i64} {
  func.func @_embed_max_kernel(%arg0: i32, %arg1: i32, %arg2: memref<1x32x256xf32, #tpu.memory_space<vmem>>, %arg3: memref<1x8x256xf32, #tpu.memory_space<vmem>>, %arg4: memref<64x32xf32, #tpu.memory_space<vmem>>, %arg5: memref<64x8xf32, #tpu.memory_space<vmem>>, %arg6: memref<1x64x128xf32, #tpu.memory_space<vmem>>, %arg7: memref<1x64x256xf32, #tpu.memory_space<vmem>>) attributes {dimension_semantics = [#tpu.dimension_semantics<parallel>, #tpu.dimension_semantics<arbitrary>], iteration_bounds = array<i64: 2, 1>, scalar_prefetch = 0 : i64, scratch_operands = 1 : i64, tpu.core_type = #tpu.core_type<tc>, window_params = [{transform_indices = @transform_0, window_bounds = array<i64: 1, 32, 256>}, {transform_indices = @transform_1, window_bounds = array<i64: 1, 8, 256>}, {pipeline_mode = #tpu.pipeline_mode<synchronous>, transform_indices = @transform_2, window_bounds = array<i64: 64, 32>}, {pipeline_mode = #tpu.pipeline_mode<synchronous>, transform_indices = @transform_3, window_bounds = array<i64: 64, 8>}, {transform_indices = @transform_4, window_bounds = array<i64: 1, 64, 128>}]} {
    %c0_i32 = arith.constant 0 : i32
    %0 = arith.cmpi eq, %arg1, %c0_i32 : i32
    %1 = arith.extui %0 : i1 to i32
    %c0_i32_0 = arith.constant 0 : i32
    %2 = arith.cmpi ne, %1, %c0_i32_0 : i32
    scf.if %2 {
      %cst_19 = arith.constant 0xFF800000 : f32
      %21 = vector.broadcast %cst_19 : f32 to vector<1x64x256xf32>
      %c0_20 = arith.constant 0 : index
      %c0_21 = arith.constant 0 : index
      %c0_22 = arith.constant 0 : index
      %22 = vector.load %arg7[%c0_20, %c0_21, %c0_22] : memref<1x64x256xf32, #tpu.memory_space<vmem>>, vector<1x64x256xf32>
      tpu.vector_store %arg7[%c0_20, %c0_21, %c0_22], %21 {strides = array<i32>} : memref<1x64x256xf32, #tpu.memory_space<vmem>>, vector<1x64x256xf32>,
    } else {
    }
    %c0 = arith.constant 0 : index
    %c0_1 = arith.constant 0 : index
    %3 = vector.load %arg4[%c0, %c0_1] : memref<64x32xf32, #tpu.memory_space<vmem>>, vector<64x32xf32>
    %c0_2 = arith.constant 0 : index
    %c0_3 = arith.constant 0 : index
    %c0_4 = arith.constant 0 : index
    %4 = vector.load %arg2[%c0_2, %c0_3, %c0_4] : memref<1x32x256xf32, #tpu.memory_space<vmem>>, vector<1x32x256xf32>
    %5 = vector.shape_cast %4 : vector<1x32x256xf32> to vector<32x256xf32>
    %cst = arith.constant dense<0.000000e+00> : vector<64x256xf32>
    %6 = tpu.matmul %3, %5, %cst {dimension_numbers = #tpu.dot_dimension_numbers<[1], [0], [0], [1], [0, 0, 1, 1], [], []>} : vector<64x32xf32>, vector<32x256xf32>, vector<64x256xf32> -> vector<64x256xf32>
    %c0_5 = arith.constant 0 : index
    %c0_6 = arith.constant 0 : index
    %7 = vector.load %arg5[%c0_5, %c0_6] : memref<64x8xf32, #tpu.memory_space<vmem>>, vector<64x8xf32>
    %c0_7 = arith.constant 0 : index
    %c0_8 = arith.constant 0 : index
    %c0_9 = arith.constant 0 : index
    %8 = vector.load %arg3[%c0_7, %c0_8, %c0_9] : memref<1x8x256xf32, #tpu.memory_space<vmem>>, vector<1x8x256xf32>
    %9 = vector.shape_cast %8 : vector<1x8x256xf32> to vector<8x256xf32>
    %cst_10 = arith.constant dense<0.000000e+00> : vector<64x256xf32>
    %10 = tpu.matmul %7, %9, %cst_10 {dimension_numbers = #tpu.dot_dimension_numbers<[1], [0], [0], [1], [0, 0, 1, 1], [], []>} : vector<64x8xf32>, vector<8x256xf32>, vector<64x256xf32> -> vector<64x256xf32>
    %11 = arith.addf %6, %10 : vector<64x256xf32>
    %c0_11 = arith.constant 0 : index
    %c0_12 = arith.constant 0 : index
    %c0_13 = arith.constant 0 : index
    %12 = vector.load %arg7[%c0_11, %c0_12, %c0_13] : memref<1x64x256xf32, #tpu.memory_space<vmem>>, vector<1x64x256xf32>
    %13 = vector.shape_cast %12 : vector<1x64x256xf32> to vector<64x256xf32>
    %14 = arith.maximumf %13, %11 : vector<64x256xf32>
    %c0_14 = arith.constant 0 : index
    %c0_15 = arith.constant 0 : index
    %c0_16 = arith.constant 0 : index
    %15 = vector.load %arg7[%c0_14, %c0_15, %c0_16] : memref<1x64x256xf32, #tpu.memory_space<vmem>>, vector<1x64x256xf32>
    %16 = vector.shape_cast %15 : vector<1x64x256xf32> to vector<64x256xf32>
    %17 = vector.shape_cast %14 : vector<64x256xf32> to vector<1x64x256xf32>
    tpu.vector_store %arg7[%c0_14, %c0_15, %c0_16], %17 {strides = array<i32>} : memref<1x64x256xf32, #tpu.memory_space<vmem>>, vector<1x64x256xf32>,
    %c0_i32_17 = arith.constant 0 : i32
    %18 = arith.cmpi eq, %arg1, %c0_i32_17 : i32
    %19 = arith.extui %18 : i1 to i32
    %c0_i32_18 = arith.constant 0 : i32
    %20 = arith.cmpi ne, %19, %c0_i32_18 : i32
    scf.if %20 {
      %c0_19 = arith.constant 0 : index
      %c0_20 = arith.constant 0 : index
      %c0_21 = arith.constant 0 : index
      %21 = vector.load %arg7[%c0_19, %c0_20, %c0_21] : memref<1x64x256xf32, #tpu.memory_space<vmem>>, vector<1x64x256xf32>
      %22 = vector.shape_cast %21 : vector<1x64x256xf32> to vector<64x256xf32>
      %23 = vector.extract_strided_slice %22 {offsets = [0, 0], sizes = [64, 128], strides = [1, 1]} : vector<64x256xf32> to vector<64x128xf32>
      %24 = vector.extract_strided_slice %22 {offsets = [0, 128], sizes = [64, 128], strides = [1, 1]} : vector<64x256xf32> to vector<64x128xf32>
      %25 = arith.maximumf %23, %24 : vector<64x128xf32>
      %c0_22 = arith.constant 0 : index
      %c0_23 = arith.constant 0 : index
      %c0_24 = arith.constant 0 : index
      %26 = vector.load %arg6[%c0_22, %c0_23, %c0_24] : memref<1x64x128xf32, #tpu.memory_space<vmem>>, vector<1x64x128xf32>
      %27 = vector.shape_cast %26 : vector<1x64x128xf32> to vector<64x128xf32>
      %28 = vector.shape_cast %25 : vector<64x128xf32> to vector<1x64x128xf32>
      tpu.vector_store %arg6[%c0_22, %c0_23, %c0_24], %28 {strides = array<i32>} : memref<1x64x128xf32, #tpu.memory_space<vmem>>, vector<1x64x128xf32>,
    } else {
    }
    return
  }
  func.func @transform_0(%arg0: i32, %arg1: i32) -> (i32, i32, i32) {
    %c0_i32 = arith.constant 0 : i32
    %c0_i32_0 = arith.constant 0 : i32
    return %arg0, %c0_i32, %arg1 : i32, i32, i32
  }
  func.func @transform_1(%arg0: i32, %arg1: i32) -> (i32, i32, i32) {
    %c0_i32 = arith.constant 0 : i32
    %c0_i32_0 = arith.constant 0 : i32
    return %arg0, %c0_i32, %arg1 : i32, i32, i32
  }
  func.func @transform_2(%arg0: i32, %arg1: i32) -> (i32, i32) {
    %c0_i32 = arith.constant 0 : i32
    %c0_i32_0 = arith.constant 0 : i32
    %c0_i32_1 = arith.constant 0 : i32
    return %c0_i32, %c0_i32_0 : i32, i32
  }
  func.func @transform_3(%arg0: i32, %arg1: i32) -> (i32, i32) {
    %c0_i32 = arith.constant 0 : i32
    %c0_i32_0 = arith.constant 0 : i32
    %c0_i32_1 = arith.constant 0 : i32
    return %c0_i32, %c0_i32_0 : i32, i32
  }
  func.func @transform_4(%arg0: i32, %arg1: i32) -> (i32, i32, i32) {
    %c0_i32 = arith.constant 0 : i32
    %c0_i32_0 = arith.constant 0 : i32
    %c0_i32_1 = arith.constant 0 : i32
    return %arg0, %c0_i32, %c0_i32_0 : i32, i32, i32
  }
}

</mosaic_0001>

<bundles_post_ra>
// kernel: tpu_custom_call.1
= control target key start
LH: loop header
LB: loop body
LE: loop exit
PB: predicated region body
PF: predicated region fallthrough
CT: control target
= control target key end

     0   :  { %9 = vsyncpa [#allocation4], 0  ;;  %s1122_s0 = inlined_call_operand.vmem [shape: f32[2,32,256], index: 0, kind: input, shape index: {}]   ;;  %s1123_s1 = inlined_call_operand.vmem [shape: f32[2,8,256], index: 1, kind: input, shape index: {}]   ;;  %s1124_s2 = inlined_call_operand.vmem [shape: f32[64,32], index: 2, kind: input, shape index: {}]   ;;  %s1125_s3 = inlined_call_operand.vmem [shape: f32[64,8], index: 3, kind: input, shape index: {}]   ;;  %s1126_s4 = inlined_call_operand.hbm [shape: f32[2,64,128], index: 4, kind: output, shape index: {}]  }
   0x1   :  { %11 = vsyncpa [#allocation4 + $0x1], 0  ;;  %s927_s15 = smov 0   ;;  %s929_s16 = smov 0  }
   0x2   :  { %s931_s17 = smov 0   ;;  %s933_s18 = smov 0  }
   0x3   :  { %s935_s19 = smov 0   ;;  %s937_s20 = smov 0  }
   0x4 LB: > { %s713_s21 = sadd.s32 4294967295, %s898_s20   ;;  %s714_s22 = sadd.s32 4294967294, %s898_s20   ;;  %s898_s20 = sphi %s937_s20, %s17_s20   ;;  %s894_s19 = sphi %s935_s19, %s1133_s19   ;;  %s890_s18 = sphi %s933_s18, %s1132_s18   ;;  %s886_s17 = sphi %s931_s17, %s1131_s17   ;;  %s882_s16 = sphi %s929_s16, %s1130_s16   ;;  %s878_s15 = sphi %s927_s15, %s1129_s15  }
   0x5   : > { %s29_s23 = sadd.s32 1, %s894_s19  ;;  %s134_s24 = sadd.s32 1, %s886_s17 }
   0x6   : > { %p31_p0 = scmp.ge.s32.totalorder %s29_s23, 2  ;;  %p144_p1 = scmp.ne.s32.totalorder %s886_s17, %s882_s16 }
   0x7   : > { %p145_p2 = scmp.eq.s32.totalorder %s713_s21, 1  ;;  %p150_p3 = scmp.ne.s32.totalorder %s882_s16, %s878_s15 }
   0x8   : > { %s1135_s23 = smov (%p31_p0, %s29_s23), 0  ;;  %p151_p5 = scmp.eq.s32.totalorder %s714_s22, 1 }
   0x9   : > { %p967_p4 = por %p145_p2, %p144_p1  ;;  %s131_s26 = ssub.s32 %s894_s19, %s1135_s23 }
   0xa   : > { %p717_p6 = scmp.ge.s32.totalorder %s898_s20, 1  ;;  %p132_p7 = scmp.eq.s32.totalorder %s131_s26, 0 }
   0xb   : > { %p974_p8 = por %p151_p5, %p150_p3  ;;  %p201_p9 = scmp.lt.s32.totalorder %s898_s20, 3 }
   0xc   : > { %s980_s28 = scalar_select %p132_p7, %s886_s17, %s134_s24  }
   0xd   : > { %p202_p10 = pnand %p717_p6, %p201_p9 }
   0xe   : > { %p241_p11 = scmp.lt.s32.totalorder (!%p202_p10), %s890_s18, 1  ;;  %s237_s12 = sand.u32 (!%p202_p10), 1, %s882_s16  }
   0xf   : > { %205 = sbr.rel (%p202_p10) target bundleno = 228 (0xe4), region = 36  ;;  %s718_s13 = sshll.u32 (!%p202_p10), %s237_s12, 6 }
  0x10   : > { %s1073_s14 = scalar_lea.vmem (!%p202_p10), [#allocation3], %s718_s13  ;;  %s762_s21 = sshll.u32 (!%p202_p10), %s890_s18, 6 }
  0x11   : > { %s615_s26 = scalar_lea.hbm (!%p202_p10), %s1126_s4, %s762_s21  ;;  %s840_s9 = scalar_lea.hbm (!%p202_p10), %s1126_s4, 128 }
  0x14   : > { %s242_s29 = scalar_select %p241_p11, %s890_s18, 1  ;;  %v296_v8 = vld [vmem:[%s1125_s3] sm:$0xff]  ;;  %vm306_vm0 = vcmask 64512   ;;  %vm413_vm1 = vcmask 261120   ;;  %v297_v12 = vld [vmem:[%s1125_s3 + $0x8] sm:$0xff]  ;;  %v298_v14 = vld [vmem:[%s1125_s3 + $0x10] sm:$0xff] }
  0x15   : > { %v280_v11 = vld [vmem:[%s1124_s2] sm:$0xff]  ;;  %v281_v13 = vld [vmem:[%s1124_s2 + $0x8] sm:$0xff]  ;;  %v282_v15 = vld [vmem:[%s1124_s2 + $0x10] sm:$0xff]  ;;  %s604_s18 = scalar_lea.sflag [#allocation4], %s237_s12 }
  0x16   : > { %s760_s30 = sshll.u32 %s242_s29, 6  ;;  %s761_s5 = sshll.u32 %s242_s29, 4  ;;  %v299_v16 = vld [vmem:[%s1125_s3 + $0x18] sm:$0xff]  ;;  %v300_v18 = vld [vmem:[%s1125_s3 + $0x20] sm:$0xff]  ;;  %v301_v20 = vld [vmem:[%s1125_s3 + $0x28] sm:$0xff] }
  0x17   : > { %s248_s8 = scalar_lea.vmem %s1122_s0, %s760_s30  ;;  %s258_s11 = scalar_lea.vmem %s1123_s1, %s761_s5  ;;  %v283_v17 = vld [vmem:[%s1124_s2 + $0x18] sm:$0xff]  ;;  %v284_v19 = vld [vmem:[%s1124_s2 + $0x20] sm:$0xff]  ;;  %v285_v21 = vld [vmem:[%s1124_s2 + $0x28] sm:$0xff] }
  0x18   : > { %v294_v0 = vld [vmem:[%s248_s8 + $0x30] sm:$0xff]  ;;  %v295_v1 = vld [vmem:[%s248_s8 + $0x38] sm:$0xff]  ;;  %v292_v2 = vld [vmem:[%s248_s8 + $0x20] sm:$0xff]  ;;  %s616_s29 = sshll.u32 %s1073_s14, 4  ;;  %s618_s30 = sshll.u32 %s615_s26, 4  ;;  %s617_s29 = int_to_ptr.vmem [resolvable:$true] %s616_s29  ;;  %s619_s30 = int_to_ptr.hbm [resolvable:$true] %s618_s30 }
  0x19   : > { %450 = vmatpush.msra.mxu2 %v294_v0  ;;  %491 = vmatpush.msra.mxu3 %v295_v1  ;;  %v293_v3 = vld [vmem:[%s248_s8 + $0x28] sm:$0xff]  ;;  %v290_v4 = vld [vmem:[%s248_s8 + $0x10] sm:$0xff]  ;;  %v291_v5 = vld [vmem:[%s248_s8 + $0x18] sm:$0xff]  ;;  %s834_s5 = sshra.s32 %s619_s30, 4  ;;  %s835_s5 = int_to_ptr.hbm [resolvable:$true] %s834_s5 }
  0x1a   : > { %v304_v6 = vld [vmem:[%s258_s11] sm:$0xff]  ;;  %v305_v7 = vld [vmem:[%s258_s11 + $0x8] sm:$0xff]  ;;  %v302_v22 = vld [vmem:[%s1125_s3 + $0x30] sm:$0xff]  ;;  %s836_s6 = scalar_lea.hbm %s835_s5, 64  ;;  %p841_p1 = scmp.lt.s32.totalorder %s835_s5, %s1126_s4 }
  0x1b   : > { %451 = vmatpush.msra.mxu2 %v292_v2  ;;  %492 = vmatpush.msra.mxu3 %v293_v3  ;;  %v288_v9 = vld [vmem:[%s248_s8] sm:$0xff]  ;;  %v289_v10 = vld [vmem:[%s248_s8 + $0x8] sm:$0xff]  ;;  %v286_v23 = vld [vmem:[%s1124_s2 + $0x30] sm:$0xff]  ;;  %p837_p12 = scmp.ne.s32.totalorder %s835_s5, %s836_s6  ;;  %p842_p2 = scmp.lt.s32.totalorder %s840_s9, %s836_s6 }
  0x1c   : > { %346 = vmatpush.msra.mxu0 %v304_v6  ;;  %387 = vmatpush.msra.mxu1 %v305_v7  ;;  %v303_v24 = vld [vmem:[%s1125_s3 + $0x38] sm:$0xff] }
  0x1d   : > { %452 = vmatpush.msra.mxu2 %v290_v4  ;;  %493 = vmatpush.msra.mxu3 %v291_v5  ;;  %v287_v25 = vld [vmem:[%s1124_s2 + $0x38] sm:$0xff]  ;;  %p838_p13 = pnand %p837_p12, %p967_p4  ;;  %p843_p3 = por %p842_p2, %p841_p1 }
  0x1e   : > { %723 = vmatmul.msk.f32.vlgmr.msra.gmra.mxu0 %vm306_vm0, %v296_v8  ;;  %731 = vmatmul.msk.f32.vlgmr.msra.gmra.mxu1 %vm306_vm0, %v296_v8 }
  0x1f   : > { %453 = vmatpush.msra.mxu2 %v288_v9  ;;  %494 = vmatpush.msra.mxu3 %v289_v10  ;;  %p839_p0 = pneg %p838_p13 }
  0x20   : > { %739 = vmatmul.msk.f32.vlgmr.msra.gmra.mxu2 %vm413_vm1, %v280_v11  ;;  %747 = vmatmul.msk.f32.vlgmr.msra.gmra.mxu3 %vm413_vm1, %v280_v11 }
  0x21   : > { %p844_p5 = pnand %p843_p3, %p839_p0 }
  0x26   : > { %724 = vmatmul.msk.f32.gmra.mxu0 %vm306_vm0, %v297_v12  ;;  %732 = vmatmul.msk.f32.gmra.mxu1 %vm306_vm0, %v297_v12 }
  0x28   : > { %740 = vmatmul.msk.f32.gmra.mxu2 %vm413_vm1, %v281_v13  ;;  %748 = vmatmul.msk.f32.gmra.mxu3 %vm413_vm1, %v281_v13 }
  0x2e   : > { %725 = vmatmul.msk.f32.gmra.mxu0 %vm306_vm0, %v298_v14  ;;  %733 = vmatmul.msk.f32.gmra.mxu1 %vm306_vm0, %v298_v14 }
  0x30   : > { %741 = vmatmul.msk.f32.gmra.mxu2 %vm413_vm1, %v282_v15  ;;  %749 = vmatmul.msk.f32.gmra.mxu3 %vm413_vm1, %v282_v15 }
  0x36   : > { %726 = vmatmul.msk.f32.gmra.mxu0 %vm306_vm0, %v299_v16  ;;  %734 = vmatmul.msk.f32.gmra.mxu1 %vm306_vm0, %v299_v16 }
  0x38   : > { %742 = vmatmul.msk.f32.gmra.mxu2 %vm413_vm1, %v283_v17  ;;  %750 = vmatmul.msk.f32.gmra.mxu3 %vm413_vm1, %v283_v17 }
  0x3e   : > { %727 = vmatmul.msk.f32.gmra.mxu0 %vm306_vm0, %v300_v18  ;;  %735 = vmatmul.msk.f32.gmra.mxu1 %vm306_vm0, %v300_v18 }
  0x40   : > { %743 = vmatmul.msk.f32.gmra.mxu2 %vm413_vm1, %v284_v19  ;;  %751 = vmatmul.msk.f32.gmra.mxu3 %vm413_vm1, %v284_v19 }
  0x46   : > { %728 = vmatmul.msk.f32.gmra.mxu0 %vm306_vm0, %v301_v20  ;;  %736 = vmatmul.msk.f32.gmra.mxu1 %vm306_vm0, %v301_v20 }
  0x48   : > { %744 = vmatmul.msk.f32.gmra.mxu2 %vm413_vm1, %v285_v21  ;;  %752 = vmatmul.msk.f32.gmra.mxu3 %vm413_vm1, %v285_v21 }
  0x4e   : > { %729 = vmatmul.msk.f32.gmra.mxu0 %vm306_vm0, %v302_v22  ;;  %737 = vmatmul.msk.f32.gmra.mxu1 %vm306_vm0, %v302_v22 }
  0x50   : > { %745 = vmatmul.msk.f32.gmra.mxu2 %vm413_vm1, %v286_v23  ;;  %753 = vmatmul.msk.f32.gmra.mxu3 %vm413_vm1, %v286_v23 }
  0x56   : > { %730 = vmatmul.msk.f32.gmra.mxu0 %vm306_vm0, %v303_v24  ;;  %738 = vmatmul.msk.f32.gmra.mxu1 %vm306_vm0, %v303_v24 }
  0x58   : > { %746 = vmatmul.msk.f32.gmra.mxu2 %vm413_vm1, %v287_v25  ;;  %754 = vmatmul.msk.f32.gmra.mxu3 %vm413_vm1, %v287_v25 }
  0x9b   : > { %v348_v26 = vpop.f32.mrf.mxu0  ;;  %v389_v27 = vpop.f32.mrf.mxu1 }
  0xa3   : > { %v455_v28 = vpop.f32.mrf.mxu2  ;;  %v496_v29 = vpop.f32.mrf.mxu3 }
  0xa4   : > { %v456_v30 = vadd.f32 %v455_v28, %v348_v26  ;;  %v497_v31 = vadd.f32 %v496_v29, %v389_v27  ;;  %v351_v32 = vpop.f32.mrf.mxu0  ;;  %v392_v33 = vpop.f32.mrf.mxu1 }
  0xa6   : > { %v587_v34 = vmax.f32 %v456_v30, %v497_v31 }
  0xa8   : > { %595 = vst [vmem:[%s1073_s14] sm:$0xff] %v587_v34 }
  0xab   : > { %v458_v35 = vpop.f32.mrf.mxu2  ;;  %v499_v36 = vpop.f32.mrf.mxu3 }
  0xac   : > { %v459_v37 = vadd.f32 %v458_v35, %v351_v32  ;;  %v500_v38 = vadd.f32 %v499_v36, %v392_v33  ;;  %v354_v39 = vpop.f32.mrf.mxu0  ;;  %v395_v40 = vpop.f32.mrf.mxu1 }
  0xae   : > { %v588_v41 = vmax.f32 %v459_v37, %v500_v38 }
  0xb0   : > { %596 = vst [vmem:[%s1073_s14 + $0x8] sm:$0xff] %v588_v41 }
  0xb3   : > { %v461_v42 = vpop.f32.mrf.mxu2  ;;  %v502_v43 = vpop.f32.mrf.mxu3 }
  0xb4   : > { %v462_v44 = vadd.f32 %v461_v42, %v354_v39  ;;  %v503_v45 = vadd.f32 %v502_v43, %v395_v40  ;;  %v357_v46 = vpop.f32.mrf.mxu0  ;;  %v398_v47 = vpop.f32.mrf.mxu1 }
  0xb6   : > { %v589_v48 = vmax.f32 %v462_v44, %v503_v45 }
  0xb8   : > { %597 = vst [vmem:[%s1073_s14 + $0x10] sm:$0xff] %v589_v48 }
  0xbb   : > { %v464_v49 = vpop.f32.mrf.mxu2  ;;  %v505_v50 = vpop.f32.mrf.mxu3 }
  0xbc   : > { %v465_v51 = vadd.f32 %v464_v49, %v357_v46  ;;  %v506_v52 = vadd.f32 %v505_v50, %v398_v47  ;;  %v360_v53 = vpop.f32.mrf.mxu0  ;;  %v401_v54 = vpop.f32.mrf.mxu1 }
  0xbe   : > { %v590_v55 = vmax.f32 %v465_v51, %v506_v52 }
  0xc0   : > { %598 = vst [vmem:[%s1073_s14 + $0x18] sm:$0xff] %v590_v55 }
  0xc3   : > { %v467_v56 = vpop.f32.mrf.mxu2  ;;  %v508_v57 = vpop.f32.mrf.mxu3 }
  0xc4   : > { %v468_v58 = vadd.f32 %v467_v56, %v360_v53  ;;  %v509_v59 = vadd.f32 %v508_v57, %v401_v54  ;;  %v363_v60 = vpop.f32.mrf.mxu0  ;;  %v404_v61 = vpop.f32.mrf.mxu1 }
  0xc6   : > { %v591_v62 = vmax.f32 %v468_v58, %v509_v59 }
  0xc8   : > { %599 = vst [vmem:[%s1073_s14 + $0x20] sm:$0xff] %v591_v62 }
  0xcb   : > { %v470_v63 = vpop.f32.mrf.mxu2  ;;  %v511_v0 = vpop.f32.mrf.mxu3 }
  0xcc   : > { %v471_v1 = vadd.f32 %v470_v63, %v363_v60  ;;  %v512_v2 = vadd.f32 %v511_v0, %v404_v61  ;;  %v366_v4 = vpop.f32.mrf.mxu0  ;;  %v407_v5 = vpop.f32.mrf.mxu1 }
  0xce   : > { %v592_v3 = vmax.f32 %v471_v1, %v512_v2 }
  0xd0   : > { %600 = vst [vmem:[%s1073_s14 + $0x28] sm:$0xff] %v592_v3 }
  0xd3   : > { %v473_v6 = vpop.f32.mrf.mxu2  ;;  %v514_v7 = vpop.f32.mrf.mxu3 }
  0xd4   : > { %v474_v8 = vadd.f32 %v473_v6, %v366_v4  ;;  %v515_v9 = vadd.f32 %v514_v7, %v407_v5  ;;  %v369_v11 = vpop.f32.mrf.mxu0  ;;  %v410_v12 = vpop.f32.mrf.mxu1 }
  0xd6   : > { %v593_v10 = vmax.f32 %v474_v8, %v515_v9 }
  0xd8   : > { %601 = vst [vmem:[%s1073_s14 + $0x30] sm:$0xff] %v593_v10 }
  0xdb   : > { %v476_v13 = vpop.f32.mrf.mxu2  ;;  %v517_v14 = vpop.f32.mrf.mxu3 }
  0xdc   : > { %v477_v15 = vadd.f32 %v476_v13, %v369_v11  ;;  %v518_v16 = vadd.f32 %v517_v14, %v410_v12 }
  0xde   : > { %v594_v17 = vmax.f32 %v477_v15, %v518_v16 }
  0xe0   : > { %602 = vst [vmem:[%s1073_s14 + $0x38] sm:$0xff] %v594_v17 }
  0xe1   : > { %847 = shalt.err (!%p844_p5)
}
  0xe2   : > { %s900_s12 = smov 128   ;;  %s901_s13 = smov 8  }
  0xe3   : > { %763 = dma.vmem_to_hbm [thread:$0]  (%p967_p4), %s617_s29, 1024, %s619_s30, %s604_s18, %s900_s12, %s900_s12, %s901_s13  }
  0xe4 PF: > { %p769_p6 = scmp.ge.s32.totalorder %s898_s20, 2  ;;  %s633_s14 = sand.u32 1, %s878_s15  }
  0xe5   : > { %s634_s21 = scalar_lea.sflag [#allocation4], %s633_s14 }
  0xe6   : > { %p766_p7 = pnand %p769_p6, %p974_p8 }
  0xe8   : > { %p767_p9 = pneg %p766_p7 }
  0xea   : > { %873 = dma.done.wait (%p767_p9), %s634_s21, 1024  }
  0xeb   : > { %875 = vsyncadd (%p767_p9), %s634_s21, 4294966272  ;;  %s17_s20 = sadd.s32 1, %s898_s20   ;;  %s1129_s15 = smov %s882_s16 }
  0xec   : > { %p14_p10 = scmp.ge.s32.totalorder %s17_s20, 4   ;;  %s1130_s16 = smov %s886_s17 }
  0xed   : > { %s1131_s17 = smov %s980_s28  ;;  %s1132_s18 = smov %s894_s19 }
  0xee   : > { %s1133_s19 = smov %s1135_s23  ;;  %16 = sbr.rel (!%p14_p10) target bundleno = 4 (0x4), region = 82 }
  0xf3   :  { %640 = vsyncpa [#allocation4], 1 }
  0xf4   :  { %642 = vsyncpa [#allocation4 + $0x1], 1 }

</bundles_post_ra>
